<compile_context>
chip_gen: v7x
topology: tpu7x:2x2x1
jax: 0.10.0
libtpu: 0.0.40
codegen_flags: <defaults>
</compile_context>

<pallas_src>
import jax
import jax.numpy as jnp
from jax import lax
from jax.experimental import pallas as pl
from jax.experimental.pallas import tpu as pltpu  # noqa: F401  (TPU backend assumed)

# ----------------------------- sizes -----------------------------------------
IN_FEATURES = 4096          # hardcoded in the PyTorch module
NUM_MAKES = 16
NUM_MODELS = 32
NUM_SUBMODELS = 24
NUM_GENERATION = 16
NUM_CLASSES = 64
HEADS = NUM_MAKES + NUM_MODELS + NUM_SUBMODELS + NUM_GENERATION   # 88
HEADS_PAD = 128             # pad concatenated head columns to a full lane width
CLS_PAD = 128               # pad class logits to a full lane width
OUT_PAD = HEADS_PAD + CLS_PAD   # single lane-dense output slab (B, 256)
BATCH = 8


# ----------------------------- kernel -----------------------------------------
def aux_heads_kernel(feat_ref, w_big_ref, b_big_ref, w_cls_ref, b_cls_ref,
                     out_ref):
    """All four heads via one native-bf16 MXU matmul, class head fused on top."""
    x = feat_ref[...]                                     # (B, 4096) bf16
    # bf16 x bf16 -> f32 accumulation: native MXU rate on v5e/v6e/v7x.
    heads = (jnp.dot(x, w_big_ref[...], preferred_element_type=jnp.float32)
             + b_big_ref[...])                            # (B, 128) f32
    # Columns [HEADS:HEADS_PAD] of `heads` are exactly zero (zero weight cols +
    # zero bias) and the matching rows of w_cls are zero, so the fused class
    # matmul is exact. Kept in f32: it is tiny (128x128x128).
    cls = (jnp.dot(heads, w_cls_ref[...], preferred_element_type=jnp.float32)
           + b_cls_ref[...])                              # (B, 128) f32
    # One lane-dense (B, 256) writeback: unmasked, 128-aligned stores.
    out_ref[:, 0:HEADS_PAD] = heads.astype(out_ref.dtype)
    out_ref[:, HEADS_PAD:OUT_PAD] = cls.astype(out_ref.dtype)


def aux_heads(feats, w_big, b_big, w_cls_pad, b_cls_pad):
    """feats: (B, IN_FEATURES). Returns (cls, make, model, submodel, generation)."""
    B = feats.shape[0]
    flops = 2 * B * IN_FEATURES * HEADS_PAD + 2 * B * HEADS_PAD * CLS_PAD
    bytes_accessed = (B * IN_FEATURES * 2                 # feats (bf16)
                      + IN_FEATURES * HEADS_PAD * 2       # w_big (bf16)
                      + HEADS_PAD * 4                     # b_big
                      + HEADS_PAD * CLS_PAD * 4           # w_cls_pad
                      + CLS_PAD * 4                       # b_cls_pad
                      + B * OUT_PAD * 4)                  # output slab
    out = pl.pallas_call(
        aux_heads_kernel,
        out_shape=jax.ShapeDtypeStruct((B, OUT_PAD), jnp.float32),
        cost_estimate=pl.CostEstimate(flops=flops, transcendentals=0,
                                      bytes_accessed=bytes_accessed),
    )(feats.astype(jnp.bfloat16), w_big, b_big, w_cls_pad, b_cls_pad)

    heads = out[:, :HEADS_PAD]
    cls = out[:, HEADS_PAD:HEADS_PAD + NUM_CLASSES]
    o1 = NUM_MAKES
    o2 = o1 + NUM_MODELS
    o3 = o2 + NUM_SUBMODELS
    make = heads[:, :o1]
    model = heads[:, o1:o2]
    submodel = heads[:, o2:o3]
    generation = heads[:, o3:HEADS]
    return cls, make, model, submodel, generation


# ----------------------------- params / packing -------------------------------
def init_params(key):
    ks = jax.random.split(key, 12)
    s = 0.02

    def w(k, shape):
        return (s * jax.random.normal(k, shape)).astype(jnp.float32)

    # Linear weights in (in, out) convention; biases kept as (1, N).
    w_make = w(ks[0], (IN_FEATURES, NUM_MAKES))
    b_make = w(ks[1], (1, NUM_MAKES))
    w_model = w(ks[2], (IN_FEATURES, NUM_MODELS))
    b_model = w(ks[3], (1, NUM_MODELS))
    w_sub = w(ks[4], (IN_FEATURES, NUM_SUBMODELS))
    b_sub = w(ks[5], (1, NUM_SUBMODELS))
    w_gen = w(ks[6], (IN_FEATURES, NUM_GENERATION))
    b_gen = w(ks[7], (1, NUM_GENERATION))
    w_cls = w(ks[8], (HEADS, NUM_CLASSES))
    b_cls = w(ks[9], (1, NUM_CLASSES))

    module_params = (w_make, b_make, w_model, b_model, w_sub, b_sub,
                     w_gen, b_gen, w_cls, b_cls)

    # base stub: flatten(NCHW) -> 4096
    w_base = w(ks[10], (4 * 16 * 16, IN_FEATURES))
    b_base = w(ks[11], (1, IN_FEATURES))
    return module_params, (w_base, b_base)


def pack_kernel_params(module_params):
    (w_make, b_make, w_model, b_model, w_sub, b_sub,
     w_gen, b_gen, w_cls, b_cls) = module_params
    pad_cols = HEADS_PAD - HEADS
    # One lane-dense big weight (bf16) covering all four heads; zero-padded.
    w_big = jnp.concatenate([w_make, w_model, w_sub, w_gen], axis=1)   # (4096, 88)
    w_big = jnp.pad(w_big, ((0, 0), (0, pad_cols))).astype(jnp.bfloat16)
    b_big = jnp.pad(jnp.concatenate([b_make, b_model, b_sub, b_gen], axis=1),
                    ((0, 0), (0, pad_cols)))                           # (1, 128) f32
    # Class weight padded with zero rows (consume padded head slab) and zero
    # cols (lane-dense 128-wide class output).
    w_cls_pad = jnp.pad(w_cls, ((0, pad_cols), (0, CLS_PAD - NUM_CLASSES)))  # (128,128)
    b_cls_pad = jnp.pad(b_cls, ((0, 0), (0, CLS_PAD - NUM_CLASSES)))         # (1,128)
    return w_big, b_big, w_cls_pad, b_cls_pad


# ----------------------------- glue / reference --------------------------------
def base_stub(x_nchw, base_params):
    # TODO(synk): the real `base` backbone (e.g. VGG16 up to classifier[5]) is an
    # external, unspecified module; a flatten+Linear stub stands in for it
    # (the replaced classifier[6] = Dropout is identity at inference).
    w_base, b_base = base_params
    B = x_nchw.shape[0]
    return x_nchw.reshape(B, -1) @ w_base + b_base


def reference_forward(feats, module_params):
    """Pure-JAX reference of AuxillaryLearning_C.forward.

    Uses the same bf16-quantized feats / head weights as the kernel so the
    check measures only kernel math (MXU accumulation order), not the bf16
    storage error vs the original f32 PyTorch module.
    """
    (w_make, b_make, w_model, b_model, w_sub, b_sub,
     w_gen, b_gen, w_cls, b_cls) = module_params
    q = lambda a: a.astype(jnp.bfloat16).astype(jnp.float32)
    hi = lax.Precision.HIGHEST
    xq = q(feats)
    make = jnp.dot(xq, q(w_make), precision=hi) + b_make
    model = jnp.dot(xq, q(w_model), precision=hi) + b_model
    sub = jnp.dot(xq, q(w_sub), precision=hi) + b_sub
    gen = jnp.dot(xq, q(w_gen), precision=hi) + b_gen
    concat = jnp.concatenate([make, model, sub, gen], axis=1)
    cls = jnp.dot(concat, w_cls, precision=hi) + b_cls
    return cls, make, model, sub, gen


if __name__ == "__main__":
    key = jax.random.PRNGKey(0)
    module_params, base_params = init_params(key)
    w_big, b_big, w_cls_pad, b_cls_pad = pack_kernel_params(module_params)

    # NCHW input image, small spatial size
    x = jax.random.normal(jax.random.PRNGKey(1), (BATCH, 4, 16, 16),
                          dtype=jnp.float32)
    feats = base_stub(x, base_params)                     # (B, 4096) f32

    cls, make, model, sub, gen = aux_heads(feats, w_big, b_big,
                                           w_cls_pad, b_cls_pad)
    jax.block_until_ready(cls)

    cls_r, mk_r, mo_r, sb_r, gn_r = reference_forward(feats, module_params)
    checks = (("make", make, mk_r), ("model", model, mo_r),
              ("submodel", sub, sb_r), ("generation", gen, gn_r),
              ("class", cls, cls_r))
    for name, got, want in checks:
        assert got.shape == want.shape, f"{name}: shape mismatch {got.shape} vs {want.shape}"
        assert jnp.allclose(got, want, rtol=1e-2, atol=1e-2), f"{name}: mismatch vs reference"

    print("KERNEL_OK")
</pallas_src>

<mosaic_0001>
module attributes {stable_mosaic.version = 11 : i64} {
  func.func @aux_heads_kernel(%arg0: memref<8x4096xbf16, #tpu.memory_space<vmem>>, %arg1: memref<4096x128xbf16, #tpu.memory_space<vmem>>, %arg2: memref<1x128xf32, #tpu.memory_space<vmem>>, %arg3: memref<128x128xf32, #tpu.memory_space<vmem>>, %arg4: memref<1x128xf32, #tpu.memory_space<vmem>>, %arg5: memref<8x256xf32, #tpu.memory_space<vmem>>) attributes {dimension_semantics = [], scalar_prefetch = 0 : i64, scratch_operands = 0 : i64, tpu.core_type = #tpu.core_type<tc>} {
    %c0 = arith.constant 0 : index
    %c0_0 = arith.constant 0 : index
    %0 = vector.load %arg0[%c0, %c0_0] : memref<8x4096xbf16, #tpu.memory_space<vmem>>, vector<8x4096xbf16>
    %c0_1 = arith.constant 0 : index
    %c0_2 = arith.constant 0 : index
    %1 = vector.load %arg1[%c0_1, %c0_2] : memref<4096x128xbf16, #tpu.memory_space<vmem>>, vector<4096x128xbf16>
    %cst = arith.constant dense<0.000000e+00> : vector<8x128xf32>
    %2 = tpu.matmul %0, %1, %cst {dimension_numbers = #tpu.dot_dimension_numbers<[1], [0], [0], [1], [0, 0, 1, 1], [], []>} : vector<8x4096xbf16>, vector<4096x128xbf16>, vector<8x128xf32> -> vector<8x128xf32>
    %c0_3 = arith.constant 0 : index
    %c0_4 = arith.constant 0 : index
    %3 = vector.load %arg2[%c0_3, %c0_4] : memref<1x128xf32, #tpu.memory_space<vmem>>, vector<1x128xf32>
    %4 = vector.broadcast %3 : vector<1x128xf32> to vector<8x128xf32>
    %5 = arith.addf %2, %4 : vector<8x128xf32>
    %c0_5 = arith.constant 0 : index
    %c0_6 = arith.constant 0 : index
    %6 = vector.load %arg3[%c0_5, %c0_6] : memref<128x128xf32, #tpu.memory_space<vmem>>, vector<128x128xf32>
    %cst_7 = arith.constant dense<0.000000e+00> : vector<8x128xf32>
    %7 = tpu.matmul %5, %6, %cst_7 {dimension_numbers = #tpu.dot_dimension_numbers<[1], [0], [0], [1], [0, 0, 1, 1], [], []>} : vector<8x128xf32>, vector<128x128xf32>, vector<8x128xf32> -> vector<8x128xf32>
    %c0_8 = arith.constant 0 : index
    %c0_9 = arith.constant 0 : index
    %8 = vector.load %arg4[%c0_8, %c0_9] : memref<1x128xf32, #tpu.memory_space<vmem>>, vector<1x128xf32>
    %9 = vector.broadcast %8 : vector<1x128xf32> to vector<8x128xf32>
    %10 = arith.addf %7, %9 : vector<8x128xf32>
    %c0_10 = arith.constant 0 : index
    %c0_11 = arith.constant 0 : index
    %11 = vector.load %arg5[%c0_10, %c0_11] : memref<8x256xf32, #tpu.memory_space<vmem>>, vector<8x128xf32>
    tpu.vector_store %arg5[%c0_10, %c0_11], %5 {strides = array<i32>} : memref<8x256xf32, #tpu.memory_space<vmem>>, vector<8x128xf32>,
    %c0_12 = arith.constant 0 : index
    %c128 = arith.constant 128 : index
    %12 = vector.load %arg5[%c0_12, %c128] : memref<8x256xf32, #tpu.memory_space<vmem>>, vector<8x128xf32>
    tpu.vector_store %arg5[%c0_12, %c128], %10 {strides = array<i32>} : memref<8x256xf32, #tpu.memory_space<vmem>>, vector<8x128xf32>,
    return
  }
}

</mosaic_0001>

<bundles_post_ra>
// kernel: tpu_custom_call.1
= control target key start
LH: loop header
LB: loop body
LE: loop exit
PB: predicated region body
PF: predicated region fallthrough
CT: control target
= control target key end

     0   :  { %10 = vsyncpa [#allocation3], 0  ;;  %s4201_s0 = inlined_call_operand.hbm [shape: bf16[8,4096], index: 0, kind: input, shape index: {}]   ;;  %s4202_s1 = inlined_call_operand.hbm [shape: bf16[4096,128], index: 1, kind: input, shape index: {}]   ;;  %s4203_s2 = inlined_call_operand.vmem [shape: f32[1,128], index: 2, kind: input, shape index: {}]   ;;  %s4204_s3 = inlined_call_operand.hbm [shape: f32[128,128], index: 3, kind: input, shape index: {}]   ;;  %s4205_s4 = inlined_call_operand.vmem [shape: f32[1,128], index: 4, kind: input, shape index: {}]   ;;  %s4206_s5 = inlined_call_operand.hbm [shape: f32[8,256], index: 5, kind: output, shape index: {}]  }
   0x1   :  { %11 = vsyncpa [#allocation6], 0 }
   0x2   :  { %12 = vsyncpa [#allocation4], 0  ;;  %s4106_s18 = smov [#allocation5]   ;;  %s4012_s22 = scalar_lea.hbm %s4202_s1, 32768 }
   0x3   :  { %s28_s19 = sshll.u32 %s4106_s18, 4  ;;  %p4013_p0 = scmp.ne.s32.totalorder %s4202_s1, %s4012_s22  ;;  %s29_s19 = int_to_ptr.vmem [resolvable:$true] %s28_s19 }
   0x4   :  { %p4016_p1 = scmp.lt.u32.totalorder %s4012_s22, %s4202_s1 }
   0x6   :  { %p4018_p2 = pnand %p4016_p1, %p4013_p0 }
   0x8   :  { %4021 = shalt.err (!%p4018_p2)
}
   0x9   :  { %s4022_s27 = scalar_lea.vmem %s29_s19, 32768  ;;  %p4027_p4 = scmp.lt.s32.totalorder %s29_s19, %s29_s19 }
   0xa   :  { %p4023_p3 = scmp.ne.s32.totalorder %s29_s19, %s4022_s27  ;;  %p4028_p5 = scmp.lt.s32.totalorder %s4022_s27, %s4022_s27 }
   0xc   :  { %p4029_p6 = por %p4028_p5, %p4027_p4 }
   0xe   :  { %p4030_p7 = pnand %p4029_p6, %p4023_p3 }
  0x10   :  { %4033 = shalt.err (!%p4030_p7)
}
  0x11   :  { %s4107_s28 = smov 64   ;;  %s4108_s29 = smov 4  }
  0x12   :  { %34 = dma.hbm_to_vmem [thread:$0]  %s4202_s1, 32768, %s29_s19, [#allocation6], %s4107_s28, %s4107_s28, %s4108_s29  }
  0x13   :  { %s4109_s7 = smov [#allocation2]   ;;  %s4110_s9 = smov [#allocation7]  }
  0x14   :  { %s19_s8 = sshll.u32 %s4109_s7, 4  ;;  %s42_s10 = sshll.u32 %s4110_s9, 4  ;;  %s20_s8 = int_to_ptr.vmem [resolvable:$true] %s19_s8  ;;  %s43_s10 = int_to_ptr.vmem [resolvable:$true] %s42_s10 }
  0x15   :  { %s4034_s13 = scalar_lea.hbm %s4201_s0, 2048 }
  0x16   :  { %p4035_p8 = scmp.ne.s32.totalorder %s4201_s0, %s4034_s13  ;;  %p4038_p9 = scmp.lt.u32.totalorder %s4034_s13, %s4201_s0 }
  0x18   :  { %p4040_p10 = pnand %p4038_p9, %p4035_p8 }
  0x1a   :  { %4043 = shalt.err (!%p4040_p10)
}
  0x1b   :  { %s4044_s1 = scalar_lea.vmem %s20_s8, 2048  ;;  %p4049_p12 = scmp.lt.s32.totalorder %s20_s8, %s20_s8 }
  0x1c   :  { %p4045_p11 = scmp.ne.s32.totalorder %s20_s8, %s4044_s1  ;;  %p4050_p13 = scmp.lt.s32.totalorder %s4044_s1, %s4044_s1 }
  0x1e   :  { %p4051_p0 = por %p4050_p13, %p4049_p12 }
  0x20   :  { %p4052_p1 = pnand %p4051_p0, %p4045_p11 }
  0x22   :  { %4055 = shalt.err (!%p4052_p1)
}
  0x23   :  { %22 = dma.hbm_to_vmem [thread:$0]  %s4201_s0, 2048, %s20_s8, [#allocation3]  }
  0x24   :  { %s4056_s22 = scalar_lea.hbm %s4204_s3, 2048 }
  0x25   :  { %p4057_p2 = scmp.ne.s32.totalorder %s4204_s3, %s4056_s22  ;;  %p4060_p3 = scmp.lt.u32.totalorder %s4056_s22, %s4204_s3 }
  0x27   :  { %p4062_p4 = pnand %p4060_p3, %p4057_p2 }
  0x29   :  { %4065 = shalt.err (!%p4062_p4)
}
  0x2a   :  { %s4066_s27 = scalar_lea.vmem %s43_s10, 2048  ;;  %p4071_p6 = scmp.lt.s32.totalorder %s43_s10, %s43_s10 }
  0x2b   :  { %p4067_p5 = scmp.ne.s32.totalorder %s43_s10, %s4066_s27  ;;  %p4072_p7 = scmp.lt.s32.totalorder %s4066_s27, %s4066_s27 }
  0x2d   :  { %p4073_p8 = por %p4072_p7, %p4071_p6 }
  0x2f   :  { %p4074_p9 = pnand %p4073_p8, %p4067_p5 }
  0x31   :  { %4077 = shalt.err (!%p4074_p9)
}
  0x32   :  { %s4111_s0 = smov 128   ;;  %s4112_s28 = smov 8  }
  0x33   :  { %48 = dma.hbm_to_vmem [thread:$0]  %s4204_s3, 2048, %s43_s10, [#allocation6], %s4111_s0, %s4111_s0, %s4112_s28  }
  0x34   :  { %4100 = dma.done.wait [#allocation3], 2048  }
  0x35   :  { %4101 = vsyncadd [#allocation3], 4294965248 }
  0x36   :  { %4102 = dma.done.wait [#allocation6], 34816  }
  0x37   :  { %4103 = vsyncadd [#allocation6], 4294932480  ;;  %v3724_v0 = vld [vmem:[#allocation5 + $0x40] sm:$0xff]   ;;  %v3728_v4 = vld [vmem:[#allocation5 + $0x48] sm:$0xff]   ;;  %vm4114_vm0 = vmmov 0   ;;  %s4116_s8 = smov [#allocation8]  }
  0x38   :  { %v3725_v1 = vld [vmem:[#allocation5 + $0xc0] sm:$0xff]   ;;  %3285 = vmatprep.subr.bf16.mxu0 %v3724_v0  ;;  %v3729_v5 = vld [vmem:[#allocation5 + $0xc8] sm:$0xff]   ;;  %v3732_v8 = vld [vmem:[#allocation5 + $0x50] sm:$0xff]   ;;  %s2985_s9 = sshll.u32 %s4116_s8, 4  ;;  %s2986_s9 = int_to_ptr.vmem [resolvable:$true] %s2985_s9 }
  0x39   :  { %v3726_v2 = vld [vmem:[#allocation5] sm:$0xff]   ;;  %3307 = vmatprep.subr.bf16.mxu1 %v3725_v1  ;;  %v3730_v6 = vld [vmem:[#allocation5 + $0x8] sm:$0xff]   ;;  %v3733_v9 = vld [vmem:[#allocation5 + $0xd0] sm:$0xff]   ;;  %s4078_s10 = scalar_lea.vmem %s2986_s9, 256  ;;  %p4083_p11 = scmp.lt.s32.totalorder %s2986_s9, %s2986_s9 }
  0x3a   :  { %v3727_v3 = vld [vmem:[#allocation5 + $0x80] sm:$0xff]   ;;  %3286 = vmatpush3.bf16.msra.mxu0 %v3726_v2  ;;  %v3731_v7 = vld [vmem:[#allocation5 + $0x88] sm:$0xff]   ;;  %v3734_v10 = vld [vmem:[#allocation5 + $0x10] sm:$0xff]   ;;  %p4079_p10 = scmp.ne.s32.totalorder %s2986_s9, %s4078_s10  ;;  %p4084_p12 = scmp.lt.s32.totalorder %s4078_s10, %s4078_s10 }
  0x3b   :  { %3308 = vmatpush3.bf16.msra.mxu1 %v3727_v3  ;;  %3287 = vmatprep.subr.bf16.mxu0 %v3728_v4  ;;  %v3735_v11 = vld [vmem:[#allocation5 + $0x90] sm:$0xff]   ;;  %v3736_v12 = vld [vmem:[#allocation5 + $0x58] sm:$0xff]   ;;  %v3740_v16 = vld [vmem:[#allocation5 + $0x60] sm:$0xff]  }
  0x3c   :  { %3309 = vmatprep.subr.bf16.mxu1 %v3729_v5  ;;  %v3737_v13 = vld [vmem:[#allocation5 + $0xd8] sm:$0xff]   ;;  %v3741_v17 = vld [vmem:[#allocation5 + $0xe0] sm:$0xff]   ;;  %v3744_v20 = vld [vmem:[#allocation5 + $0x68] sm:$0xff]   ;;  %p4085_p13 = por %p4084_p12, %p4083_p11 }
  0x3d   :  { %v3738_v14 = vld [vmem:[#allocation5 + $0x18] sm:$0xff]   ;;  %v3742_v18 = vld [vmem:[#allocation5 + $0x20] sm:$0xff]   ;;  %v3745_v21 = vld [vmem:[#allocation5 + $0xe8] sm:$0xff]  }
  0x3e   :  { %3288 = vmatpush3.bf16.msra.mxu0 %v3730_v6  ;;  %v3739_v15 = vld [vmem:[#allocation5 + $0x98] sm:$0xff]   ;;  %v3743_v19 = vld [vmem:[#allocation5 + $0xa0] sm:$0xff]   ;;  %v3746_v22 = vld [vmem:[#allocation5 + $0x28] sm:$0xff]   ;;  %p4086_p0 = pnand %p4085_p13, %p4079_p10 }
  0x3f   :  { %3310 = vmatpush3.bf16.msra.mxu1 %v3731_v7  ;;  %3289 = vmatprep.subr.bf16.mxu0 %v3732_v8  ;;  %v3747_v23 = vld [vmem:[#allocation5 + $0xa8] sm:$0xff]   ;;  %v3748_v24 = vld [vmem:[#allocation5 + $0x70] sm:$0xff]   ;;  %v3752_v28 = vld [vmem:[#allocation5 + $0x78] sm:$0xff]  }
  0x40   :  { %3311 = vmatprep.subr.bf16.mxu1 %v3733_v9  ;;  %v3749_v25 = vld [vmem:[#allocation5 + $0xf0] sm:$0xff]   ;;  %v3753_v29 = vld [vmem:[#allocation5 + $0xf8] sm:$0xff]   ;;  %v61_v32 = vld [vmem:[#allocation2] sm:$0xff] }
  0x41   :  { %v3750_v26 = vld [vmem:[#allocation5 + $0x30] sm:$0xff]   ;;  %v3754_v30 = vld [vmem:[#allocation5 + $0x38] sm:$0xff]   ;;  %v62_v33 = vld [vmem:[#allocation2 + $0x8] sm:$0xff]  ;;  %v2996_v34 = vcombine.low %v61_v32, %v61_v32  ;;  %v2997_v35 = vcombine.high %v61_v32, %v61_v32 }
  0x42   :  { %3290 = vmatpush3.bf16.msra.mxu0 %v3734_v10  ;;  %v3751_v27 = vld [vmem:[#allocation5 + $0xb0] sm:$0xff]   ;;  %v3755_v31 = vld [vmem:[#allocation5 + $0xb8] sm:$0xff]   ;;  %v2998_v36 = vcombine.low %v62_v33, %v62_v33  ;;  %v2999_v37 = vcombine.high %v62_v33, %v62_v33  ;;  %v3760_v38 = vld [vmem:[#allocation5 + $0x140] sm:$0xff]  }
  0x43   :  { %3312 = vmatpush3.bf16.msra.mxu1 %v3735_v11  ;;  %3291 = vmatprep.subr.bf16.mxu0 %v3736_v12  ;;  %v3761_v39 = vld [vmem:[#allocation5 + $0x1c0] sm:$0xff]   ;;  %v3764_v42 = vld [vmem:[#allocation5 + $0x148] sm:$0xff]   ;;  %v3768_v46 = vld [vmem:[#allocation5 + $0x150] sm:$0xff]  }
  0x44   :  { %3313 = vmatprep.subr.bf16.mxu1 %v3737_v13  ;;  %2276 = vmatprep.mubr.bf16.mxu0 %v2997_v35  ;;  %v3762_v40 = vld [vmem:[#allocation5 + $0x100] sm:$0xff]   ;;  %v3765_v43 = vld [vmem:[#allocation5 + $0x1c8] sm:$0xff]   ;;  %v3769_v47 = vld [vmem:[#allocation5 + $0x1d0] sm:$0xff]  }
  0x45   :  { %2316 = vmatprep.mubr.bf16.mxu1 %v2999_v37  ;;  %v3763_v41 = vld [vmem:[#allocation5 + $0x180] sm:$0xff]   ;;  %v3766_v44 = vld [vmem:[#allocation5 + $0x108] sm:$0xff]   ;;  %v3770_v48 = vld [vmem:[#allocation5 + $0x110] sm:$0xff]  }
  0x46   :  { %3292 = vmatpush3.bf16.msra.mxu0 %v3738_v14  ;;  %v3767_v45 = vld [vmem:[#allocation5 + $0x188] sm:$0xff]   ;;  %v3771_v49 = vld [vmem:[#allocation5 + $0x190] sm:$0xff]   ;;  %v3772_v50 = vld [vmem:[#allocation5 + $0x158] sm:$0xff]  }
  0x47   :  { %3314 = vmatpush3.bf16.msra.mxu1 %v3739_v15  ;;  %3293 = vmatprep.subr.bf16.mxu0 %v3740_v16  ;;  %v3773_v51 = vld [vmem:[#allocation5 + $0x1d8] sm:$0xff]   ;;  %v3776_v54 = vld [vmem:[#allocation5 + $0x160] sm:$0xff]   ;;  %v3780_v58 = vld [vmem:[#allocation5 + $0x168] sm:$0xff]  }
  0x48   :  { %3315 = vmatprep.subr.bf16.mxu1 %v3741_v17  ;;  %v3774_v52 = vld [vmem:[#allocation5 + $0x118] sm:$0xff]   ;;  %v3777_v55 = vld [vmem:[#allocation5 + $0x1e0] sm:$0xff]   ;;  %v3781_v59 = vld [vmem:[#allocation5 + $0x1e8] sm:$0xff]  }
  0x49   :  { %v3775_v53 = vld [vmem:[#allocation5 + $0x198] sm:$0xff]   ;;  %v3778_v56 = vld [vmem:[#allocation5 + $0x120] sm:$0xff]   ;;  %v3782_v60 = vld [vmem:[#allocation5 + $0x128] sm:$0xff]  }
  0x4a   :  { %3294 = vmatpush3.bf16.msra.mxu0 %v3742_v18  ;;  %v3779_v57 = vld [vmem:[#allocation5 + $0x1a0] sm:$0xff]   ;;  %v3783_v61 = vld [vmem:[#allocation5 + $0x1a8] sm:$0xff]   ;;  %v3784_v62 = vld [vmem:[#allocation5 + $0x170] sm:$0xff]  }
  0x4b   :  { %3316 = vmatpush3.bf16.msra.mxu1 %v3743_v19  ;;  %3295 = vmatprep.subr.bf16.mxu0 %v3744_v20  ;;  %v3785_v63 = vld [vmem:[#allocation5 + $0x1f0] sm:$0xff]   ;;  %v3788_v2 = vld [vmem:[#allocation5 + $0x178] sm:$0xff]   ;;  %v3796_v12 = vld [vmem:[#allocation5 + $0x240] sm:$0xff]  }
  0x4c   :  { %3317 = vmatprep.subr.bf16.mxu1 %v3745_v21  ;;  %v3786_v0 = vld [vmem:[#allocation5 + $0x130] sm:$0xff]   ;;  %v3789_v3 = vld [vmem:[#allocation5 + $0x1f8] sm:$0xff]   ;;  %v3797_v13 = vld [vmem:[#allocation5 + $0x2c0] sm:$0xff]  }
  0x4d   :  { %v3787_v1 = vld [vmem:[#allocation5 + $0x1b0] sm:$0xff]   ;;  %v3790_v4 = vld [vmem:[#allocation5 + $0x138] sm:$0xff]   ;;  %v3798_v14 = vld [vmem:[#allocation5 + $0x200] sm:$0xff]  }
  0x4e   :  { %3296 = vmatpush3.bf16.msra.mxu0 %v3746_v22  ;;  %v3791_v5 = vld [vmem:[#allocation5 + $0x1b8] sm:$0xff]   ;;  %v63_v6 = vld [vmem:[#allocation2 + $0x10] sm:$0xff]  ;;  %v3799_v15 = vld [vmem:[#allocation5 + $0x280] sm:$0xff]  }
  0x4f   :  { %3318 = vmatpush3.bf16.msra.mxu1 %v3747_v23  ;;  %3297 = vmatprep.subr.bf16.mxu0 %v3748_v24  ;;  %v3000_v7 = vcombine.low %v63_v6, %v63_v6  ;;  %v3001_v8 = vcombine.high %v63_v6, %v63_v6  ;;  %v64_v9 = vld [vmem:[#allocation2 + $0x18] sm:$0xff]  ;;  %v3800_v16 = vld [vmem:[#allocation5 + $0x248] sm:$0xff]   ;;  %v3804_v20 = vld [vmem:[#allocation5 + $0x250] sm:$0xff]  }
  0x50   :  { %3319 = vmatprep.subr.bf16.mxu1 %v3749_v25  ;;  %v3002_v10 = vcombine.low %v64_v9, %v64_v9  ;;  %v3003_v11 = vcombine.high %v64_v9, %v64_v9  ;;  %v3801_v17 = vld [vmem:[#allocation5 + $0x2c8] sm:$0xff]   ;;  %v3805_v21 = vld [vmem:[#allocation5 + $0x2d0] sm:$0xff]   ;;  %v3808_v24 = vld [vmem:[#allocation5 + $0x258] sm:$0xff]  }
  0x51   :  { %v3802_v18 = vld [vmem:[#allocation5 + $0x208] sm:$0xff]   ;;  %v3806_v22 = vld [vmem:[#allocation5 + $0x210] sm:$0xff]   ;;  %v3809_v25 = vld [vmem:[#allocation5 + $0x2d8] sm:$0xff]  }
  0x52   :  { %3298 = vmatpush3.bf16.msra.mxu0 %v3750_v26  ;;  %v3803_v19 = vld [vmem:[#allocation5 + $0x288] sm:$0xff]   ;;  %v3807_v23 = vld [vmem:[#allocation5 + $0x290] sm:$0xff]   ;;  %v3810_v26 = vld [vmem:[#allocation5 + $0x218] sm:$0xff]  }
  0x53   :  { %3320 = vmatpush3.bf16.msra.mxu1 %v3751_v27  ;;  %3299 = vmatprep.subr.bf16.mxu0 %v3752_v28  ;;  %v3811_v27 = vld [vmem:[#allocation5 + $0x298] sm:$0xff]   ;;  %v3812_v28 = vld [vmem:[#allocation5 + $0x260] sm:$0xff]   ;;  %v3816_v32 = vld [vmem:[#allocation5 + $0x268] sm:$0xff]  }
  0x54   :  { %3321 = vmatprep.subr.bf16.mxu1 %v3753_v29  ;;  %v3813_v29 = vld [vmem:[#allocation5 + $0x2e0] sm:$0xff]   ;;  %v3817_v33 = vld [vmem:[#allocation5 + $0x2e8] sm:$0xff]   ;;  %v3821_v37 = vld [vmem:[#allocation5 + $0x2f0] sm:$0xff]  }
  0x55   :  { %v3819_v35 = vld [vmem:[#allocation5 + $0x2a8] sm:$0xff]  }
  0x56   :  { %3300 = vmatpush3.bf16.msra.mxu0 %v3754_v30  ;;  %v3814_v30 = vld [vmem:[#allocation5 + $0x220] sm:$0xff]   ;;  %v3852_v6 = vld [vmem:[#allocation5 + $0x368] sm:$0xff]  }
  0x57   :  { %3322 = vmatpush3.bf16.msra.mxu1 %v3755_v31  ;;  %3329 = vmatprep.subr.bf16.mxu0 %v3760_v38  ;;  %v3815_v31 = vld [vmem:[#allocation5 + $0x2a0] sm:$0xff]   ;;  %v3822_v38 = vld [vmem:[#allocation5 + $0x230] sm:$0xff]   ;;  %v3855_v9 = vld [vmem:[#allocation5 + $0x3a8] sm:$0xff]  }
  0x58   :  { %3351 = vmatprep.subr.bf16.mxu1 %v3761_v39  ;;  %v3823_v39 = vld [vmem:[#allocation5 + $0x2b0] sm:$0xff]  }
  0x59   :  { %2277 = vmatmul.mubr.bf16.vlgmr.msra.gmra.mrb[0].mxu0 %v2996_v34  ;;  %v3818_v34 = vld [vmem:[#allocation5 + $0x228] sm:$0xff]  }
  0x5a   :  { %2317 = vmatmul.mubr.bf16.vlgmr.msra.gmra.mrb[0].mxu1 %v2998_v36  ;;  %3330 = vmatpush3.bf16.msra.mxu0 %v3762_v40  ;;  %v3820_v36 = vld [vmem:[#allocation5 + $0x270] sm:$0xff]   ;;  %v3824_v40 = vld [vmem:[#allocation5 + $0x278] sm:$0xff]  }
  0x5b   :  { %3352 = vmatpush3.bf16.msra.mxu1 %v3763_v41  ;;  %3331 = vmatprep.subr.bf16.mxu0 %v3764_v42  ;;  %v3825_v41 = vld [vmem:[#allocation5 + $0x2f8] sm:$0xff]  }
  0x5c   :  { %3353 = vmatprep.subr.bf16.mxu1 %v3765_v43  ;;  %2356 = vmatprep.mubr.bf16.mxu0 %v3001_v8  ;;  %v3826_v42 = vld [vmem:[#allocation5 + $0x238] sm:$0xff]   ;;  %v3854_v8 = vld [vmem:[#allocation5 + $0x328] sm:$0xff]  }
  0x5d   :  { %2396 = vmatprep.mubr.bf16.mxu1 %v3003_v11  ;;  %v3827_v43 = vld [vmem:[#allocation5 + $0x2b8] sm:$0xff]   ;;  %v3857_v11 = vld [vmem:[#allocation5 + $0x3f0] sm:$0xff]  }
  0x5e   :  { %3332 = vmatpush3.bf16.msra.mxu0 %v3766_v44  ;;  %v65_v44 = vld [vmem:[#allocation2 + $0x20] sm:$0xff] }
  0x5f   :  { %3354 = vmatpush3.bf16.msra.mxu1 %v3767_v45  ;;  %3333 = vmatprep.subr.bf16.mxu0 %v3768_v46  ;;  %v66_v45 = vld [vmem:[#allocation2 + $0x28] sm:$0xff]  ;;  %v3004_v46 = vcombine.low %v65_v44, %v65_v44 }
  0x60   :  { %3355 = vmatprep.subr.bf16.mxu1 %v3769_v47  ;;  %v3005_v47 = vcombine.high %v65_v44, %v65_v44  ;;  %v3888_v44 = vld [vmem:[#allocation5 + $0x468] sm:$0xff]  }
  0x62   :  { %3334 = vmatpush3.bf16.msra.mxu0 %v3770_v48  ;;  %v3006_v48 = vcombine.low %v66_v45, %v66_v45 }
  0x63   :  { %3356 = vmatpush3.bf16.msra.mxu1 %v3771_v49  ;;  %3335 = vmatprep.subr.bf16.mxu0 %v3772_v50  ;;  %v3007_v49 = vcombine.high %v66_v45, %v66_v45  ;;  %v3832_v50 = vld [vmem:[#allocation5 + $0x340] sm:$0xff]   ;;  %v3889_v45 = vld [vmem:[#allocation5 + $0x4e8] sm:$0xff]  }
  0x64   :  { %3357 = vmatprep.subr.bf16.mxu1 %v3773_v51  ;;  %v3833_v51 = vld [vmem:[#allocation5 + $0x3c0] sm:$0xff]  }
  0x66   :  { %3336 = vmatpush3.bf16.msra.mxu0 %v3774_v52  ;;  %v3834_v52 = vld [vmem:[#allocation5 + $0x300] sm:$0xff]  }
  0x67   :  { %3358 = vmatpush3.bf16.msra.mxu1 %v3775_v53  ;;  %3337 = vmatprep.subr.bf16.mxu0 %v3776_v54  ;;  %v3835_v53 = vld [vmem:[#allocation5 + $0x380] sm:$0xff]   ;;  %v3836_v54 = vld [vmem:[#allocation5 + $0x348] sm:$0xff]  }
  0x68   :  { %3359 = vmatprep.subr.bf16.mxu1 %v3777_v55  ;;  %v3837_v55 = vld [vmem:[#allocation5 + $0x3c8] sm:$0xff]  }
  0x6a   :  { %3338 = vmatpush3.bf16.msra.mxu0 %v3778_v56  ;;  %v3838_v56 = vld [vmem:[#allocation5 + $0x308] sm:$0xff]  }
  0x6b   :  { %3360 = vmatpush3.bf16.msra.mxu1 %v3779_v57  ;;  %3339 = vmatprep.subr.bf16.mxu0 %v3780_v58  ;;  %v3839_v57 = vld [vmem:[#allocation5 + $0x388] sm:$0xff]   ;;  %v3840_v58 = vld [vmem:[#allocation5 + $0x350] sm:$0xff]  }
  0x6c   :  { %3361 = vmatprep.subr.bf16.mxu1 %v3781_v59  ;;  %v3841_v59 = vld [vmem:[#allocation5 + $0x3d0] sm:$0xff]  }
  0x6e   :  { %3340 = vmatpush3.bf16.msra.mxu0 %v3782_v60  ;;  %v3842_v60 = vld [vmem:[#allocation5 + $0x310] sm:$0xff]  }
  0x6f   :  { %3362 = vmatpush3.bf16.msra.mxu1 %v3783_v61  ;;  %3341 = vmatprep.subr.bf16.mxu0 %v3784_v62  ;;  %v3843_v61 = vld [vmem:[#allocation5 + $0x390] sm:$0xff]   ;;  %v3844_v62 = vld [vmem:[#allocation5 + $0x358] sm:$0xff]  }
  0x70   :  { %3363 = vmatprep.subr.bf16.mxu1 %v3785_v63  ;;  %v3845_v63 = vld [vmem:[#allocation5 + $0x3d8] sm:$0xff]  }
  0x72   :  { %3342 = vmatpush3.bf16.msra.mxu0 %v3786_v0  ;;  %v3846_v0 = vld [vmem:[#allocation5 + $0x318] sm:$0xff]  }
  0x73   :  { %3364 = vmatpush3.bf16.msra.mxu1 %v3787_v1  ;;  %3343 = vmatprep.subr.bf16.mxu0 %v3788_v2  ;;  %v3847_v1 = vld [vmem:[#allocation5 + $0x398] sm:$0xff]   ;;  %v3848_v2 = vld [vmem:[#allocation5 + $0x360] sm:$0xff]  }
  0x74   :  { %3365 = vmatprep.subr.bf16.mxu1 %v3789_v3  ;;  %v3849_v3 = vld [vmem:[#allocation5 + $0x3e0] sm:$0xff]  }
  0x76   :  { %3344 = vmatpush3.bf16.msra.mxu0 %v3790_v4  ;;  %v3850_v4 = vld [vmem:[#allocation5 + $0x320] sm:$0xff]  }
  0x77   :  { %3366 = vmatpush3.bf16.msra.mxu1 %v3791_v5  ;;  %3373 = vmatprep.subr.bf16.mxu0 %v3796_v12  ;;  %v3851_v5 = vld [vmem:[#allocation5 + $0x3a0] sm:$0xff]   ;;  %v3858_v12 = vld [vmem:[#allocation5 + $0x330] sm:$0xff]  }
  0x78   :  { %3395 = vmatprep.subr.bf16.mxu1 %v3797_v13  ;;  %v3859_v13 = vld [vmem:[#allocation5 + $0x3b0] sm:$0xff]  }
  0x79   :  { %2357 = vmatmul.mubr.bf16.vlgmr.msra.gmra.mrb[4].mxu0 %v3000_v7  ;;  %v3853_v7 = vld [vmem:[#allocation5 + $0x3e8] sm:$0xff]  }
  0x7a   :  { %2397 = vmatmul.mubr.bf16.vlgmr.msra.gmra.mrb[4].mxu1 %v3002_v10  ;;  %3374 = vmatpush3.bf16.msra.mxu0 %v3798_v14  ;;  %v3856_v10 = vld [vmem:[#allocation5 + $0x370] sm:$0xff]   ;;  %v3860_v14 = vld [vmem:[#allocation5 + $0x378] sm:$0xff]  }
  0x7b   :  { %3396 = vmatpush3.bf16.msra.mxu1 %v3799_v15  ;;  %3375 = vmatprep.subr.bf16.mxu0 %v3800_v16  ;;  %v3861_v15 = vld [vmem:[#allocation5 + $0x3f8] sm:$0xff]  }
  0x7c   :  { %3397 = vmatprep.subr.bf16.mxu1 %v3801_v17  ;;  %2436 = vmatprep.mubr.bf16.mxu0 %v3005_v47  ;;  %v3862_v16 = vld [vmem:[#allocation5 + $0x338] sm:$0xff]   ;;  %v3891_v47 = vld [vmem:[#allocation5 + $0x4a8] sm:$0xff]  }
  0x7d   :  { %2476 = vmatprep.mubr.bf16.mxu1 %v3007_v49  ;;  %v3863_v17 = vld [vmem:[#allocation5 + $0x3b8] sm:$0xff]   ;;  %v3893_v49 = vld [vmem:[#allocation5 + $0x4f0] sm:$0xff]  }
  0x7e   :  { %3376 = vmatpush3.bf16.msra.mxu0 %v3802_v18  ;;  %v67_v18 = vld [vmem:[#allocation2 + $0x30] sm:$0xff] }
  0x7f   :  { %3398 = vmatpush3.bf16.msra.mxu1 %v3803_v19  ;;  %3377 = vmatprep.subr.bf16.mxu0 %v3804_v20  ;;  %v68_v19 = vld [vmem:[#allocation2 + $0x38] sm:$0xff]  ;;  %v3008_v20 = vcombine.low %v67_v18, %v67_v18 }
  0x80   :  { %3399 = vmatprep.subr.bf16.mxu1 %v3805_v21  ;;  %v3009_v21 = vcombine.high %v67_v18, %v67_v18  ;;  %v3924_v18 = vld [vmem:[#allocation5 + $0x568] sm:$0xff]  }
  0x82   :  { %3378 = vmatpush3.bf16.msra.mxu0 %v3806_v22  ;;  %v3010_v22 = vcombine.low %v68_v19, %v68_v19 }
  0x83   :  { %3400 = vmatpush3.bf16.msra.mxu1 %v3807_v23  ;;  %3379 = vmatprep.subr.bf16.mxu0 %v3808_v24  ;;  %v3868_v23 = vld [vmem:[#allocation5 + $0x440] sm:$0xff]   ;;  %v3011_v24 = vcombine.high %v68_v19, %v68_v19  ;;  %v3925_v19 = vld [vmem:[#allocation5 + $0x5e8] sm:$0xff]  }
  0x84   :  { %3401 = vmatprep.subr.bf16.mxu1 %v3809_v25  ;;  %v3869_v25 = vld [vmem:[#allocation5 + $0x4c0] sm:$0xff]  }
  0x86   :  { %3380 = vmatpush3.bf16.msra.mxu0 %v3810_v26  ;;  %v3870_v26 = vld [vmem:[#allocation5 + $0x400] sm:$0xff]  }
  0x87   :  { %3402 = vmatpush3.bf16.msra.mxu1 %v3811_v27  ;;  %3381 = vmatprep.subr.bf16.mxu0 %v3812_v28  ;;  %v3871_v27 = vld [vmem:[#allocation5 + $0x480] sm:$0xff]   ;;  %v3872_v28 = vld [vmem:[#allocation5 + $0x448] sm:$0xff]  }
  0x88   :  { %3403 = vmatprep.subr.bf16.mxu1 %v3813_v29  ;;  %v3873_v29 = vld [vmem:[#allocation5 + $0x4c8] sm:$0xff]  }
  0x8a   :  { %3382 = vmatpush3.bf16.msra.mxu0 %v3814_v30  ;;  %v3874_v30 = vld [vmem:[#allocation5 + $0x408] sm:$0xff]  }
  0x8b   :  { %3404 = vmatpush3.bf16.msra.mxu1 %v3815_v31  ;;  %3383 = vmatprep.subr.bf16.mxu0 %v3816_v32  ;;  %v3875_v31 = vld [vmem:[#allocation5 + $0x488] sm:$0xff]   ;;  %v3876_v32 = vld [vmem:[#allocation5 + $0x450] sm:$0xff]  }
  0x8c   :  { %3405 = vmatprep.subr.bf16.mxu1 %v3817_v33  ;;  %v3877_v33 = vld [vmem:[#allocation5 + $0x4d0] sm:$0xff]  }
  0x8e   :  { %3384 = vmatpush3.bf16.msra.mxu0 %v3818_v34  ;;  %v3878_v34 = vld [vmem:[#allocation5 + $0x410] sm:$0xff]  }
  0x8f   :  { %3406 = vmatpush3.bf16.msra.mxu1 %v3819_v35  ;;  %3385 = vmatprep.subr.bf16.mxu0 %v3820_v36  ;;  %v3879_v35 = vld [vmem:[#allocation5 + $0x490] sm:$0xff]   ;;  %v3880_v36 = vld [vmem:[#allocation5 + $0x458] sm:$0xff]  }
  0x90   :  { %3407 = vmatprep.subr.bf16.mxu1 %v3821_v37  ;;  %v3881_v37 = vld [vmem:[#allocation5 + $0x4d8] sm:$0xff]  }
  0x92   :  { %3386 = vmatpush3.bf16.msra.mxu0 %v3822_v38  ;;  %v3882_v38 = vld [vmem:[#allocation5 + $0x418] sm:$0xff]  }
  0x93   :  { %3408 = vmatpush3.bf16.msra.mxu1 %v3823_v39  ;;  %3387 = vmatprep.subr.bf16.mxu0 %v3824_v40  ;;  %v3883_v39 = vld [vmem:[#allocation5 + $0x498] sm:$0xff]   ;;  %v3884_v40 = vld [vmem:[#allocation5 + $0x460] sm:$0xff]  }
  0x94   :  { %3409 = vmatprep.subr.bf16.mxu1 %v3825_v41  ;;  %v3885_v41 = vld [vmem:[#allocation5 + $0x4e0] sm:$0xff]  }
  0x96   :  { %3388 = vmatpush3.bf16.msra.mxu0 %v3826_v42  ;;  %v3886_v42 = vld [vmem:[#allocation5 + $0x420] sm:$0xff]  }
  0x97   :  { %3410 = vmatpush3.bf16.msra.mxu1 %v3827_v43  ;;  %3417 = vmatprep.subr.bf16.mxu0 %v3832_v50  ;;  %v3887_v43 = vld [vmem:[#allocation5 + $0x4a0] sm:$0xff]   ;;  %v3894_v50 = vld [vmem:[#allocation5 + $0x430] sm:$0xff]  }
  0x98   :  { %3439 = vmatprep.subr.bf16.mxu1 %v3833_v51  ;;  %v3895_v51 = vld [vmem:[#allocation5 + $0x4b0] sm:$0xff]  }
  0x99   :  { %2437 = vmatmul.mubr.bf16.vlgmr.msra.gmra.mrb[8].mxu0 %v3004_v46  ;;  %v3890_v46 = vld [vmem:[#allocation5 + $0x428] sm:$0xff]  }
  0x9a   :  { %2477 = vmatmul.mubr.bf16.vlgmr.msra.gmra.mrb[8].mxu1 %v3006_v48  ;;  %3418 = vmatpush3.bf16.msra.mxu0 %v3834_v52  ;;  %v3892_v48 = vld [vmem:[#allocation5 + $0x470] sm:$0xff]   ;;  %v3896_v52 = vld [vmem:[#allocation5 + $0x478] sm:$0xff]  }
  0x9b   :  { %3440 = vmatpush3.bf16.msra.mxu1 %v3835_v53  ;;  %3419 = vmatprep.subr.bf16.mxu0 %v3836_v54  ;;  %v3897_v53 = vld [vmem:[#allocation5 + $0x4f8] sm:$0xff]  }
  0x9c   :  { %3441 = vmatprep.subr.bf16.mxu1 %v3837_v55  ;;  %2516 = vmatprep.mubr.bf16.mxu0 %v3009_v21  ;;  %v3898_v54 = vld [vmem:[#allocation5 + $0x438] sm:$0xff]   ;;  %v3927_v21 = vld [vmem:[#allocation5 + $0x5a8] sm:$0xff]  }
  0x9d   :  { %2556 = vmatprep.mubr.bf16.mxu1 %v3011_v24  ;;  %v3899_v55 = vld [vmem:[#allocation5 + $0x4b8] sm:$0xff]   ;;  %v3930_v24 = vld [vmem:[#allocation5 + $0x530] sm:$0xff]  }
  0x9e   :  { %3420 = vmatpush3.bf16.msra.mxu0 %v3838_v56  ;;  %v69_v56 = vld [vmem:[#allocation2 + $0x40] sm:$0xff] }
  0x9f   :  { %3442 = vmatpush3.bf16.msra.mxu1 %v3839_v57  ;;  %3421 = vmatprep.subr.bf16.mxu0 %v3840_v58  ;;  %v3012_v57 = vcombine.low %v69_v56, %v69_v56  ;;  %v3013_v58 = vcombine.high %v69_v56, %v69_v56  ;;  %v3960_v56 = vld [vmem:[#allocation5 + $0x668] sm:$0xff]  }
  0xa0   :  { %3443 = vmatprep.subr.bf16.mxu1 %v3841_v59  ;;  %v70_v59 = vld [vmem:[#allocation2 + $0x48] sm:$0xff] }
  0xa2   :  { %3422 = vmatpush3.bf16.msra.mxu0 %v3842_v60  ;;  %v3014_v60 = vcombine.low %v70_v59, %v70_v59 }
  0xa3   :  { %3444 = vmatpush3.bf16.msra.mxu1 %v3843_v61  ;;  %3423 = vmatprep.subr.bf16.mxu0 %v3844_v62  ;;  %v3015_v61 = vcombine.high %v70_v59, %v70_v59  ;;  %v3904_v62 = vld [vmem:[#allocation5 + $0x540] sm:$0xff]   ;;  %v3963_v59 = vld [vmem:[#allocation5 + $0x6a8] sm:$0xff]  }
  0xa4   :  { %3445 = vmatprep.subr.bf16.mxu1 %v3845_v63  ;;  %v3905_v63 = vld [vmem:[#allocation5 + $0x5c0] sm:$0xff]  }
  0xa6   :  { %3424 = vmatpush3.bf16.msra.mxu0 %v3846_v0  ;;  %v3906_v0 = vld [vmem:[#allocation5 + $0x500] sm:$0xff]  }
  0xa7   :  { %3446 = vmatpush3.bf16.msra.mxu1 %v3847_v1  ;;  %3425 = vmatprep.subr.bf16.mxu0 %v3848_v2  ;;  %v3907_v1 = vld [vmem:[#allocation5 + $0x580] sm:$0xff]   ;;  %v3908_v2 = vld [vmem:[#allocation5 + $0x548] sm:$0xff]  }
  0xa8   :  { %3447 = vmatprep.subr.bf16.mxu1 %v3849_v3  ;;  %v3909_v3 = vld [vmem:[#allocation5 + $0x5c8] sm:$0xff]  }
  0xaa   :  { %3426 = vmatpush3.bf16.msra.mxu0 %v3850_v4  ;;  %v3910_v4 = vld [vmem:[#allocation5 + $0x508] sm:$0xff]  }
  0xab   :  { %3448 = vmatpush3.bf16.msra.mxu1 %v3851_v5  ;;  %3427 = vmatprep.subr.bf16.mxu0 %v3852_v6  ;;  %v3911_v5 = vld [vmem:[#allocation5 + $0x588] sm:$0xff]   ;;  %v3912_v6 = vld [vmem:[#allocation5 + $0x550] sm:$0xff]  }
  0xac   :  { %3449 = vmatprep.subr.bf16.mxu1 %v3853_v7  ;;  %v3913_v7 = vld [vmem:[#allocation5 + $0x5d0] sm:$0xff]  }
  0xae   :  { %3428 = vmatpush3.bf16.msra.mxu0 %v3854_v8  ;;  %v3914_v8 = vld [vmem:[#allocation5 + $0x510] sm:$0xff]  }
  0xaf   :  { %3450 = vmatpush3.bf16.msra.mxu1 %v3855_v9  ;;  %3429 = vmatprep.subr.bf16.mxu0 %v3856_v10  ;;  %v3915_v9 = vld [vmem:[#allocation5 + $0x590] sm:$0xff]   ;;  %v3916_v10 = vld [vmem:[#allocation5 + $0x558] sm:$0xff]  }
  0xb0   :  { %3451 = vmatprep.subr.bf16.mxu1 %v3857_v11  ;;  %v3917_v11 = vld [vmem:[#allocation5 + $0x5d8] sm:$0xff]  }
  0xb2   :  { %3430 = vmatpush3.bf16.msra.mxu0 %v3858_v12  ;;  %v3918_v12 = vld [vmem:[#allocation5 + $0x518] sm:$0xff]  }
  0xb3   :  { %3452 = vmatpush3.bf16.msra.mxu1 %v3859_v13  ;;  %3431 = vmatprep.subr.bf16.mxu0 %v3860_v14  ;;  %v3919_v13 = vld [vmem:[#allocation5 + $0x598] sm:$0xff]   ;;  %v3920_v14 = vld [vmem:[#allocation5 + $0x560] sm:$0xff]  }
  0xb4   :  { %3453 = vmatprep.subr.bf16.mxu1 %v3861_v15  ;;  %v3921_v15 = vld [vmem:[#allocation5 + $0x5e0] sm:$0xff]  }
  0xb6   :  { %3432 = vmatpush3.bf16.msra.mxu0 %v3862_v16  ;;  %v3922_v16 = vld [vmem:[#allocation5 + $0x520] sm:$0xff]  }
  0xb7   :  { %3454 = vmatpush3.bf16.msra.mxu1 %v3863_v17  ;;  %3461 = vmatprep.subr.bf16.mxu0 %v3868_v23  ;;  %v3923_v17 = vld [vmem:[#allocation5 + $0x5a0] sm:$0xff]   ;;  %v3929_v23 = vld [vmem:[#allocation5 + $0x5f0] sm:$0xff]  }
  0xb8   :  { %3483 = vmatprep.subr.bf16.mxu1 %v3869_v25  ;;  %v3931_v25 = vld [vmem:[#allocation5 + $0x5b0] sm:$0xff]  }
  0xb9   :  { %2517 = vmatmul.mubr.bf16.vlgmr.msra.gmra.mrb[12].mxu0 %v3008_v20  ;;  %v3926_v20 = vld [vmem:[#allocation5 + $0x528] sm:$0xff]  }
  0xba   :  { %2557 = vmatmul.mubr.bf16.vlgmr.msra.gmra.mrb[12].mxu1 %v3010_v22  ;;  %3462 = vmatpush3.bf16.msra.mxu0 %v3870_v26  ;;  %v3928_v22 = vld [vmem:[#allocation5 + $0x570] sm:$0xff]   ;;  %v3932_v26 = vld [vmem:[#allocation5 + $0x578] sm:$0xff]  }
  0xbb   :  { %3484 = vmatpush3.bf16.msra.mxu1 %v3871_v27  ;;  %3463 = vmatprep.subr.bf16.mxu0 %v3872_v28  ;;  %v3933_v27 = vld [vmem:[#allocation5 + $0x5f8] sm:$0xff]  }
  0xbc   :  { %3485 = vmatprep.subr.bf16.mxu1 %v3873_v29  ;;  %2596 = vmatprep.mubr.bf16.mxu0 %v3013_v58  ;;  %v3934_v28 = vld [vmem:[#allocation5 + $0x538] sm:$0xff]   ;;  %v3962_v58 = vld [vmem:[#allocation5 + $0x628] sm:$0xff]  }
  0xbd   :  { %2636 = vmatprep.mubr.bf16.mxu1 %v3015_v61  ;;  %v3935_v29 = vld [vmem:[#allocation5 + $0x5b8] sm:$0xff]   ;;  %v3965_v61 = vld [vmem:[#allocation5 + $0x6f0] sm:$0xff]  }
  0xbe   :  { %3464 = vmatpush3.bf16.msra.mxu0 %v3874_v30  ;;  %v71_v30 = vld [vmem:[#allocation2 + $0x50] sm:$0xff] }
  0xbf   :  { %3486 = vmatpush3.bf16.msra.mxu1 %v3875_v31  ;;  %3465 = vmatprep.subr.bf16.mxu0 %v3876_v32  ;;  %v72_v31 = vld [vmem:[#allocation2 + $0x58] sm:$0xff]  ;;  %v3016_v32 = vcombine.low %v71_v30, %v71_v30 }
  0xc0   :  { %3487 = vmatprep.subr.bf16.mxu1 %v3877_v33  ;;  %v3017_v33 = vcombine.high %v71_v30, %v71_v30  ;;  %v3995_v30 = vld [vmem:[#allocation5 + $0x7a0] sm:$0xff]  }
  0xc2   :  { %3466 = vmatpush3.bf16.msra.mxu0 %v3878_v34  ;;  %v3018_v34 = vcombine.low %v72_v31, %v72_v31 }
  0xc3   :  { %3488 = vmatpush3.bf16.msra.mxu1 %v3879_v35  ;;  %3467 = vmatprep.subr.bf16.mxu0 %v3880_v36  ;;  %v3019_v35 = vcombine.high %v72_v31, %v72_v31  ;;  %v3940_v36 = vld [vmem:[#allocation5 + $0x640] sm:$0xff]  }
  0xc4   :  { %3489 = vmatprep.subr.bf16.mxu1 %v3881_v37  ;;  %v3941_v37 = vld [vmem:[#allocation5 + $0x6c0] sm:$0xff]  }
  0xc6   :  { %3468 = vmatpush3.bf16.msra.mxu0 %v3882_v38  ;;  %v3942_v38 = vld [vmem:[#allocation5 + $0x600] sm:$0xff]  }
  0xc7   :  { %3490 = vmatpush3.bf16.msra.mxu1 %v3883_v39  ;;  %3469 = vmatprep.subr.bf16.mxu0 %v3884_v40  ;;  %v3943_v39 = vld [vmem:[#allocation5 + $0x680] sm:$0xff]   ;;  %v3944_v40 = vld [vmem:[#allocation5 + $0x648] sm:$0xff]  }
  0xc8   :  { %3491 = vmatprep.subr.bf16.mxu1 %v3885_v41  ;;  %v3945_v41 = vld [vmem:[#allocation5 + $0x6c8] sm:$0xff]  }
  0xca   :  { %3470 = vmatpush3.bf16.msra.mxu0 %v3886_v42  ;;  %v3946_v42 = vld [vmem:[#allocation5 + $0x608] sm:$0xff]  }
  0xcb   :  { %3492 = vmatpush3.bf16.msra.mxu1 %v3887_v43  ;;  %3471 = vmatprep.subr.bf16.mxu0 %v3888_v44  ;;  %v3947_v43 = vld [vmem:[#allocation5 + $0x688] sm:$0xff]   ;;  %v3948_v44 = vld [vmem:[#allocation5 + $0x650] sm:$0xff]  }
  0xcc   :  { %3493 = vmatprep.subr.bf16.mxu1 %v3889_v45  ;;  %v3949_v45 = vld [vmem:[#allocation5 + $0x6d0] sm:$0xff]  }
  0xce   :  { %3472 = vmatpush3.bf16.msra.mxu0 %v3890_v46  ;;  %v3950_v46 = vld [vmem:[#allocation5 + $0x610] sm:$0xff]  }
  0xcf   :  { %3494 = vmatpush3.bf16.msra.mxu1 %v3891_v47  ;;  %3473 = vmatprep.subr.bf16.mxu0 %v3892_v48  ;;  %v3951_v47 = vld [vmem:[#allocation5 + $0x690] sm:$0xff]   ;;  %v3952_v48 = vld [vmem:[#allocation5 + $0x658] sm:$0xff]  }
  0xd0   :  { %3495 = vmatprep.subr.bf16.mxu1 %v3893_v49  ;;  %v3953_v49 = vld [vmem:[#allocation5 + $0x6d8] sm:$0xff]  }
  0xd2   :  { %3474 = vmatpush3.bf16.msra.mxu0 %v3894_v50  ;;  %v3954_v50 = vld [vmem:[#allocation5 + $0x618] sm:$0xff]  }
  0xd3   :  { %3496 = vmatpush3.bf16.msra.mxu1 %v3895_v51  ;;  %3475 = vmatprep.subr.bf16.mxu0 %v3896_v52  ;;  %v3955_v51 = vld [vmem:[#allocation5 + $0x698] sm:$0xff]   ;;  %v3956_v52 = vld [vmem:[#allocation5 + $0x660] sm:$0xff]  }
  0xd4   :  { %3497 = vmatprep.subr.bf16.mxu1 %v3897_v53  ;;  %v3957_v53 = vld [vmem:[#allocation5 + $0x6e0] sm:$0xff]  }
  0xd6   :  { %3476 = vmatpush3.bf16.msra.mxu0 %v3898_v54  ;;  %v3958_v54 = vld [vmem:[#allocation5 + $0x620] sm:$0xff]  }
  0xd7   :  { %3498 = vmatpush3.bf16.msra.mxu1 %v3899_v55  ;;  %3505 = vmatprep.subr.bf16.mxu0 %v3904_v62  ;;  %v3959_v55 = vld [vmem:[#allocation5 + $0x6a0] sm:$0xff]   ;;  %v3966_v62 = vld [vmem:[#allocation5 + $0x630] sm:$0xff]  }
  0xd8   :  { %3527 = vmatprep.subr.bf16.mxu1 %v3905_v63  ;;  %v3967_v63 = vld [vmem:[#allocation5 + $0x6b0] sm:$0xff]  }
  0xd9   :  { %2597 = vmatmul.mubr.bf16.vlgmr.msra.gmra.mrb[16].mxu0 %v3012_v57  ;;  %v3961_v57 = vld [vmem:[#allocation5 + $0x6e8] sm:$0xff]  }
  0xda   :  { %2637 = vmatmul.mubr.bf16.vlgmr.msra.gmra.mrb[16].mxu1 %v3014_v60  ;;  %3506 = vmatpush3.bf16.msra.mxu0 %v3906_v0  ;;  %v3964_v60 = vld [vmem:[#allocation5 + $0x670] sm:$0xff]   ;;  %v3968_v0 = vld [vmem:[#allocation5 + $0x678] sm:$0xff]  }
  0xdb   :  { %3528 = vmatpush3.bf16.msra.mxu1 %v3907_v1  ;;  %3507 = vmatprep.subr.bf16.mxu0 %v3908_v2  ;;  %v3969_v1 = vld [vmem:[#allocation5 + $0x6f8] sm:$0xff]  }
  0xdc   :  { %3529 = vmatprep.subr.bf16.mxu1 %v3909_v3  ;;  %2676 = vmatprep.mubr.bf16.mxu0 %v3017_v33  ;;  %v3970_v2 = vld [vmem:[#allocation5 + $0x638] sm:$0xff]  }
  0xdd   :  { %2716 = vmatprep.mubr.bf16.mxu1 %v3019_v35  ;;  %v3971_v3 = vld [vmem:[#allocation5 + $0x6b8] sm:$0xff]  }
  0xde   :  { %3508 = vmatpush3.bf16.msra.mxu0 %v3910_v4  ;;  %v73_v4 = vld [vmem:[#allocation2 + $0x60] sm:$0xff] }
  0xdf   :  { %3530 = vmatpush3.bf16.msra.mxu1 %v3911_v5  ;;  %3509 = vmatprep.subr.bf16.mxu0 %v3912_v6  ;;  %v74_v5 = vld [vmem:[#allocation2 + $0x68] sm:$0xff]  ;;  %v3020_v6 = vcombine.low %v73_v4, %v73_v4 }
  0xe0   :  { %3531 = vmatprep.subr.bf16.mxu1 %v3913_v7  ;;  %v3021_v7 = vcombine.high %v73_v4, %v73_v4 }
  0xe2   :  { %3510 = vmatpush3.bf16.msra.mxu0 %v3914_v8  ;;  %v3022_v8 = vcombine.low %v74_v5, %v74_v5 }
  0xe3   :  { %3532 = vmatpush3.bf16.msra.mxu1 %v3915_v9  ;;  %3511 = vmatprep.subr.bf16.mxu0 %v3916_v10  ;;  %v3976_v9 = vld [vmem:[#allocation5 + $0x740] sm:$0xff]   ;;  %v3023_v10 = vcombine.high %v74_v5, %v74_v5 }
  0xe4   :  { %3533 = vmatprep.subr.bf16.mxu1 %v3917_v11  ;;  %v3977_v11 = vld [vmem:[#allocation5 + $0x7c0] sm:$0xff]  }
  0xe6   :  { %3512 = vmatpush3.bf16.msra.mxu0 %v3918_v12  ;;  %v3978_v12 = vld [vmem:[#allocation5 + $0x700] sm:$0xff]  }
  0xe7   :  { %3534 = vmatpush3.bf16.msra.mxu1 %v3919_v13  ;;  %3513 = vmatprep.subr.bf16.mxu0 %v3920_v14  ;;  %v3979_v13 = vld [vmem:[#allocation5 + $0x780] sm:$0xff]   ;;  %v3980_v14 = vld [vmem:[#allocation5 + $0x748] sm:$0xff]  }
  0xe8   :  { %3535 = vmatprep.subr.bf16.mxu1 %v3921_v15  ;;  %v3981_v15 = vld [vmem:[#allocation5 + $0x7c8] sm:$0xff]  }
  0xea   :  { %3514 = vmatpush3.bf16.msra.mxu0 %v3922_v16  ;;  %v3982_v16 = vld [vmem:[#allocation5 + $0x708] sm:$0xff]  }
  0xeb   :  { %3536 = vmatpush3.bf16.msra.mxu1 %v3923_v17  ;;  %3515 = vmatprep.subr.bf16.mxu0 %v3924_v18  ;;  %v3983_v17 = vld [vmem:[#allocation5 + $0x788] sm:$0xff]   ;;  %v3984_v18 = vld [vmem:[#allocation5 + $0x750] sm:$0xff]  }
  0xec   :  { %3537 = vmatprep.subr.bf16.mxu1 %v3925_v19  ;;  %v3985_v19 = vld [vmem:[#allocation5 + $0x7d0] sm:$0xff]  }
  0xee   :  { %3516 = vmatpush3.bf16.msra.mxu0 %v3926_v20  ;;  %v3986_v20 = vld [vmem:[#allocation5 + $0x710] sm:$0xff]  }
  0xef   :  { %3538 = vmatpush3.bf16.msra.mxu1 %v3927_v21  ;;  %3517 = vmatprep.subr.bf16.mxu0 %v3928_v22  ;;  %v3987_v21 = vld [vmem:[#allocation5 + $0x790] sm:$0xff]   ;;  %v3988_v22 = vld [vmem:[#allocation5 + $0x758] sm:$0xff]  }
  0xf0   :  { %3539 = vmatprep.subr.bf16.mxu1 %v3929_v23  ;;  %v3989_v23 = vld [vmem:[#allocation5 + $0x7d8] sm:$0xff]  }
  0xf2   :  { %3518 = vmatpush3.bf16.msra.mxu0 %v3930_v24  ;;  %v3990_v24 = vld [vmem:[#allocation5 + $0x718] sm:$0xff]  }
  0xf3   :  { %3540 = vmatpush3.bf16.msra.mxu1 %v3931_v25  ;;  %3519 = vmatprep.subr.bf16.mxu0 %v3932_v26  ;;  %v3991_v25 = vld [vmem:[#allocation5 + $0x798] sm:$0xff]   ;;  %v3992_v26 = vld [vmem:[#allocation5 + $0x760] sm:$0xff]  }
  0xf4   :  { %3541 = vmatprep.subr.bf16.mxu1 %v3933_v27  ;;  %v3993_v27 = vld [vmem:[#allocation5 + $0x7e0] sm:$0xff]  }
  0xf6   :  { %3520 = vmatpush3.bf16.msra.mxu0 %v3934_v28  ;;  %v3994_v28 = vld [vmem:[#allocation5 + $0x720] sm:$0xff]  }
  0xf7   :  { %3542 = vmatpush3.bf16.msra.mxu1 %v3935_v29  ;;  %3549 = vmatprep.subr.bf16.mxu0 %v3940_v36 }
  0xf8   :  { %3571 = vmatprep.subr.bf16.mxu1 %v3941_v37  ;;  %v3996_v37 = vld [vmem:[#allocation5 + $0x768] sm:$0xff]  }
  0xf9   :  { %2677 = vmatmul.mubr.bf16.vlgmr.msra.gmra.mrb[20].mxu0 %v3016_v32  ;;  %v2995_v32 = vld [vmem:[%s4203_s2] ss:$0 sm:$0xff] }
  0xfa   :  { %2717 = vmatmul.mubr.bf16.vlgmr.msra.gmra.mrb[20].mxu1 %v3018_v34  ;;  %3550 = vmatpush3.bf16.msra.mxu0 %v3942_v38 }
  0xfb   :  { %3572 = vmatpush3.bf16.msra.mxu1 %v3943_v39  ;;  %3551 = vmatprep.subr.bf16.mxu0 %v3944_v40  ;;  %v3997_v39 = vld [vmem:[#allocation5 + $0x7e8] sm:$0xff]  }
  0xfc   :  { %3573 = vmatprep.subr.bf16.mxu1 %v3945_v41  ;;  %2756 = vmatprep.mubr.bf16.mxu0 %v3021_v7 }
  0xfd   :  { %2796 = vmatprep.mubr.bf16.mxu1 %v3023_v10 }
  0xfe   :  { %3552 = vmatpush3.bf16.msra.mxu0 %v3946_v42  ;;  %v3998_v42 = vld [vmem:[#allocation5 + $0x728] sm:$0xff]  }
  0xff   :  { %3574 = vmatpush3.bf16.msra.mxu1 %v3947_v43  ;;  %3553 = vmatprep.subr.bf16.mxu0 %v3948_v44  ;;  %v3999_v44 = vld [vmem:[#allocation5 + $0x7a8] sm:$0xff]  }
 0x100   :  { %3575 = vmatprep.subr.bf16.mxu1 %v3949_v45 }
 0x102   :  { %3554 = vmatpush3.bf16.msra.mxu0 %v3950_v46 }
 0x103   :  { %3576 = vmatpush3.bf16.msra.mxu1 %v3951_v47  ;;  %3555 = vmatprep.subr.bf16.mxu0 %v3952_v48  ;;  %v4000_v47 = vld [vmem:[#allocation5 + $0x770] sm:$0xff]  }
 0x104   :  { %3577 = vmatprep.subr.bf16.mxu1 %v3953_v49  ;;  %v4001_v48 = vld [vmem:[#allocation5 + $0x7f0] sm:$0xff]  }
 0x105   :  { %v4002_v49 = vld [vmem:[#allocation5 + $0x730] sm:$0xff]  }
 0x106   :  { %3556 = vmatpush3.bf16.msra.mxu0 %v3954_v50  ;;  %v4003_v50 = vld [vmem:[#allocation5 + $0x7b0] sm:$0xff]  }
 0x107   :  { %3578 = vmatpush3.bf16.msra.mxu1 %v3955_v51  ;;  %3557 = vmatprep.subr.bf16.mxu0 %v3956_v52  ;;  %v4004_v51 = vld [vmem:[#allocation5 + $0x778] sm:$0xff]  }
 0x108   :  { %3579 = vmatprep.subr.bf16.mxu1 %v3957_v53  ;;  %v4005_v52 = vld [vmem:[#allocation5 + $0x7f8] sm:$0xff]  }
 0x109   :  { %v4006_v53 = vld [vmem:[#allocation5 + $0x738] sm:$0xff]  }
 0x10a   :  { %3558 = vmatpush3.bf16.msra.mxu0 %v3958_v54  ;;  %v4007_v54 = vld [vmem:[#allocation5 + $0x7b8] sm:$0xff]  }
 0x10b   :  { %3580 = vmatpush3.bf16.msra.mxu1 %v3959_v55  ;;  %3559 = vmatprep.subr.bf16.mxu0 %v3960_v56  ;;  %v75_v55 = vld [vmem:[#allocation2 + $0x70] sm:$0xff]  ;;  %v76_v56 = vld [vmem:[#allocation2 + $0x78] sm:$0xff] }
 0x10c   :  { %3581 = vmatprep.subr.bf16.mxu1 %v3961_v57  ;;  %v3024_v57 = vcombine.low %v75_v55, %v75_v55 }
 0x10e   :  { %3560 = vmatpush3.bf16.msra.mxu0 %v3962_v58  ;;  %v3025_v58 = vcombine.high %v75_v55, %v75_v55  ;;  %v2898_v55 = vld [vmem:[#allocation7 + $0x70] sm:$0xff] }
 0x10f   :  { %3582 = vmatpush3.bf16.msra.mxu1 %v3963_v59  ;;  %3561 = vmatprep.subr.bf16.mxu0 %v3964_v60  ;;  %v3026_v59 = vcombine.low %v76_v56, %v76_v56  ;;  %v3027_v60 = vcombine.high %v76_v56, %v76_v56  ;;  %v2899_v56 = vld [vmem:[#allocation7 + $0x78] sm:$0xff] }
 0x110   :  { %3583 = vmatprep.subr.bf16.mxu1 %v3965_v61 }
 0x112   :  { %3562 = vmatpush3.bf16.msra.mxu0 %v3966_v62 }
 0x113   :  { %3584 = vmatpush3.bf16.msra.mxu1 %v3967_v63  ;;  %3563 = vmatprep.subr.bf16.mxu0 %v3968_v0 }
 0x114   :  { %3585 = vmatprep.subr.bf16.mxu1 %v3969_v1 }
 0x116   :  { %3564 = vmatpush3.bf16.msra.mxu0 %v3970_v2 }
 0x117   :  { %3586 = vmatpush3.bf16.msra.mxu1 %v3971_v3  ;;  %3593 = vmatprep.subr.bf16.mxu0 %v3976_v9 }
 0x118   :  { %3615 = vmatprep.subr.bf16.mxu1 %v3977_v11 }
 0x119   :  { %2757 = vmatmul.mubr.bf16.vlgmr.msra.gmra.mrb[24].mxu0 %v3020_v6 }
 0x11a   :  { %2797 = vmatmul.mubr.bf16.vlgmr.msra.gmra.mrb[24].mxu1 %v3022_v8  ;;  %3594 = vmatpush3.bf16.msra.mxu0 %v3978_v12 }
 0x11b   :  { %3616 = vmatpush3.bf16.msra.mxu1 %v3979_v13  ;;  %3595 = vmatprep.subr.bf16.mxu0 %v3980_v14 }
 0x11c   :  { %3617 = vmatprep.subr.bf16.mxu1 %v3981_v15  ;;  %2836 = vmatprep.mubr.bf16.mxu0 %v3025_v58  ;;  %v4115_v58 = vmov 0.0  }
 0x11d   :  { %2876 = vmatprep.mubr.bf16.mxu1 %v3027_v60 }
 0x11e   :  { %3596 = vmatpush3.bf16.msra.mxu0 %v3982_v16 }
 0x11f   :  { %3618 = vmatpush3.bf16.msra.mxu1 %v3983_v17  ;;  %3597 = vmatprep.subr.bf16.mxu0 %v3984_v18 }
 0x120   :  { %3619 = vmatprep.subr.bf16.mxu1 %v3985_v19 }
 0x122   :  { %3598 = vmatpush3.bf16.msra.mxu0 %v3986_v20 }
 0x123   :  { %3620 = vmatpush3.bf16.msra.mxu1 %v3987_v21  ;;  %3599 = vmatprep.subr.bf16.mxu0 %v3988_v22  ;;  %v2884_v21 = vld [vmem:[#allocation7] sm:$0xff]  ;;  %v2885_v22 = vld [vmem:[#allocation7 + $0x8] sm:$0xff] }
 0x124   :  { %3621 = vmatprep.subr.bf16.mxu1 %v3989_v23  ;;  %v2886_v23 = vld [vmem:[#allocation7 + $0x10] sm:$0xff] }
 0x126   :  { %3600 = vmatpush3.bf16.msra.mxu0 %v3990_v24  ;;  %v4113_v24 = vmov 0.0|0.0  }
 0x127   :  { %3622 = vmatpush3.bf16.msra.mxu1 %v3991_v25  ;;  %3601 = vmatprep.subr.bf16.mxu0 %v3992_v26  ;;  %v3690_v25 = vpack.c.bf16 %v2885_v22, %v2884_v21  ;;  %v2887_v26 = vld [vmem:[#allocation7 + $0x18] sm:$0xff] }
 0x128   :  { %3623 = vmatprep.subr.bf16.mxu1 %v3993_v27  ;;  %v3693_v27 = vpack.c.bf16 %v2887_v26, %v2886_v23 }
 0x12a   :  { %3602 = vmatpush3.bf16.msra.mxu0 %v3994_v28  ;;  %v2888_v28 = vld [vmem:[#allocation7 + $0x20] sm:$0xff] }
 0x12b   :  { %3624 = vmatpush3.bf16.msra.mxu1 %v3995_v30  ;;  %3603 = vmatprep.subr.bf16.mxu0 %v3996_v37  ;;  %v2894_v37 = vld [vmem:[#allocation7 + $0x50] sm:$0xff] }
 0x12c   :  { %v3301_v29 = vpop.f32.mrb[0].mxu0  ;;  %3625 = vmatprep.subr.bf16.mxu1 %v3997_v39 }
 0x12d   :  { %v3323_v31 = vpop.f32.mrb[0].mxu1  ;;  %v3302_v33 = vpop.f32.mrb[1].mxu0 }
 0x12e   :  { %v3324_v34 = vpop.f32.mrb[1].mxu1  ;;  %v3303_v35 = vadd.f32 %v3302_v33, %v3301_v29  ;;  %v3304_v38 = vpop.f32.mrb[2].mxu0  ;;  %3604 = vmatpush3.bf16.msra.mxu0 %v3998_v42  ;;  %v2889_v29 = vld [vmem:[#allocation7 + $0x28] sm:$0xff] }
 0x12f   :  { %v3325_v36 = vadd.f32 %v3324_v34, %v3323_v31  ;;  %v3326_v40 = vpop.f32.mrb[2].mxu1  ;;  %v3305_v43 = vpop.f32.mrb[3].mxu0  ;;  %3626 = vmatpush3.bf16.msra.mxu1 %v3999_v44  ;;  %3605 = vmatprep.subr.bf16.mxu0 %v4000_v47  ;;  %v3696_v30 = vpack.c.bf16 %v2889_v29, %v2888_v28  ;;  %v2890_v31 = vld [vmem:[#allocation7 + $0x30] sm:$0xff]  ;;  %v2892_v34 = vld [vmem:[#allocation7 + $0x40] sm:$0xff]  ;;  %v2895_v38 = vld [vmem:[#allocation7 + $0x58] sm:$0xff] }
 0x130   :  { %v2279_v41 = vadd.f32 %v3303_v35, %v2995_v32  ;;  %v3327_v45 = vpop.f32.mrb[3].mxu1  ;;  %3627 = vmatprep.subr.bf16.mxu1 %v4001_v48  ;;  %v2891_v32 = vld [vmem:[#allocation7 + $0x38] sm:$0xff]  ;;  %v2893_v35 = vld [vmem:[#allocation7 + $0x48] sm:$0xff]  ;;  %v3705_v39 = vpack.c.bf16 %v2895_v38, %v2894_v37 }
 0x131   :  { %v3699_v33 = vpack.c.bf16 %v2891_v32, %v2890_v31  ;;  %v2897_v47 = vld [vmem:[#allocation7 + $0x68] sm:$0xff] }
 0x132   :  { %v2319_v46 = vadd.f32 %v3325_v36, %v2279_v41  ;;  %3606 = vmatpush3.bf16.msra.mxu0 %v4002_v49  ;;  %v3702_v36 = vpack.c.bf16 %v2893_v35, %v2892_v34 }
 0x133   :  { %3628 = vmatpush3.bf16.msra.mxu1 %v4003_v50  ;;  %3607 = vmatprep.subr.bf16.mxu0 %v4004_v51 }
 0x134   :  { %3629 = vmatprep.subr.bf16.mxu1 %v4005_v52 }
 0x136   :  { %3608 = vmatpush3.bf16.msra.mxu0 %v4006_v53 }
 0x137   :  { %3630 = vmatpush3.bf16.msra.mxu1 %v4007_v54  ;;  %3689 = vmatprep.subr.bf16.mxu0 %v4113_v24 }
 0x139   :  { %2837 = vmatmul.mubr.bf16.vlgmr.msra.gmra.mrb[28].mxu0 %v3024_v57  ;;  %v3711_v57 = vpack.c.bf16 %v2899_v56, %v2898_v55 }
 0x13a   :  { %2877 = vmatmul.mubr.bf16.vlgmr.msra.gmra.mrb[28].mxu1 %v3026_v59  ;;  %3691 = vmatpush3.bf16.msra.mxu0 %v3690_v25 }
 0x13b   :  { %3692 = vmatprep.subr.bf16.mxu0 %v4113_v24  ;;  %3686 = vmatprep.mubr.msk.f32.mxu0 %vm4114_vm0, %v4115_v58 }
 0x13e   :  { %3694 = vmatpush3.bf16.msra.mxu0 %v3693_v27 }
 0x13f   :  { %3695 = vmatprep.subr.bf16.mxu0 %v4113_v24 }
 0x142   :  { %3697 = vmatpush3.bf16.msra.mxu0 %v3696_v30 }
 0x143   :  { %3698 = vmatprep.subr.bf16.mxu0 %v4113_v24 }
 0x146   :  { %3700 = vmatpush3.bf16.msra.mxu0 %v3699_v33 }
 0x147   :  { %3701 = vmatprep.subr.bf16.mxu0 %v4113_v24 }
 0x14a   :  { %3703 = vmatpush3.bf16.msra.mxu0 %v3702_v36 }
 0x14b   :  { %3704 = vmatprep.subr.bf16.mxu0 %v4113_v24 }
 0x14c   :  { %v3345_v61 = vpop.f32.mrb[4].mxu0 }
 0x14d   :  { %v3367_v62 = vpop.f32.mrb[4].mxu1  ;;  %v3346_v63 = vpop.f32.mrb[5].mxu0 }
 0x14e   :  { %v3368_v0 = vpop.f32.mrb[5].mxu1  ;;  %v3347_v1 = vadd.f32 %v3346_v63, %v3345_v61  ;;  %v3348_v3 = vpop.f32.mrb[6].mxu0  ;;  %3706 = vmatpush3.bf16.msra.mxu0 %v3705_v39 }
 0x14f   :  { %v3369_v2 = vadd.f32 %v3368_v0, %v3367_v62  ;;  %v3370_v4 = vpop.f32.mrb[6].mxu1  ;;  %v3349_v5 = vpop.f32.mrb[7].mxu0  ;;  %3707 = vmatprep.subr.bf16.mxu0 %v4113_v24 }
 0x150   :  { %v3371_v6 = vpop.f32.mrb[7].mxu1  ;;  %v2359_v7 = vadd.f32 %v3347_v1, %v2319_v46  ;;  %v2896_v46 = vld [vmem:[#allocation7 + $0x60] sm:$0xff] }
 0x151   :  { %v3708_v51 = vpack.c.bf16 %v2897_v47, %v2896_v46 }
 0x152   :  { %v2399_v8 = vadd.f32 %v3369_v2, %v2359_v7 }
 0x153   :  { %3709 = vmatpush3.bf16.msra.mxu0 %v3708_v51 }
 0x154   :  { %3710 = vmatprep.subr.bf16.mxu0 %v4113_v24 }
 0x157   :  { %3712 = vmatpush3.bf16.msra.mxu0 %v3711_v57 }
 0x16c   :  { %v3389_v9 = vpop.f32.mrb[8].mxu0 }
 0x16d   :  { %v3411_v10 = vpop.f32.mrb[8].mxu1  ;;  %v3390_v11 = vpop.f32.mrb[9].mxu0 }
 0x16e   :  { %v3391_v12 = vadd.f32 %v3390_v11, %v3389_v9  ;;  %v3412_v13 = vpop.f32.mrb[9].mxu1  ;;  %v3392_v14 = vpop.f32.mrb[10].mxu0 }
 0x16f   :  { %v3413_v15 = vadd.f32 %v3412_v13, %v3411_v10  ;;  %v3414_v16 = vpop.f32.mrb[10].mxu1  ;;  %v3393_v17 = vpop.f32.mrb[11].mxu0 }
 0x170   :  { %v2439_v18 = vadd.f32 %v3391_v12, %v2399_v8  ;;  %v3415_v19 = vpop.f32.mrb[11].mxu1 }
 0x172   :  { %v2479_v20 = vadd.f32 %v3413_v15, %v2439_v18 }
 0x18c   :  { %v3433_v40 = vpop.f32.mrb[12].mxu0 }
 0x18d   :  { %v3455_v41 = vpop.f32.mrb[12].mxu1  ;;  %v3434_v42 = vpop.f32.mrb[13].mxu0 }
 0x18e   :  { %v3435_v43 = vadd.f32 %v3434_v42, %v3433_v40  ;;  %v3456_v44 = vpop.f32.mrb[13].mxu1  ;;  %v3436_v45 = vpop.f32.mrb[14].mxu0 }
 0x18f   :  { %v3457_v48 = vadd.f32 %v3456_v44, %v3455_v41  ;;  %v3458_v49 = vpop.f32.mrb[14].mxu1  ;;  %v3437_v50 = vpop.f32.mrb[15].mxu0 }
 0x190   :  { %v2519_v52 = vadd.f32 %v3435_v43, %v2479_v20  ;;  %v3459_v53 = vpop.f32.mrb[15].mxu1  ;;  %v3284_v43 = vld [vmem:[%s4205_s4] ss:$0 sm:$0xff] }
 0x192   :  { %v2559_v54 = vadd.f32 %v3457_v48, %v2519_v52 }
 0x1ac   :  { %v3477_v59 = vpop.f32.mrb[16].mxu0 }
 0x1ad   :  { %v3499_v60 = vpop.f32.mrb[16].mxu1  ;;  %v3478_v61 = vpop.f32.mrb[17].mxu0 }
 0x1ae   :  { %v3500_v62 = vpop.f32.mrb[17].mxu1  ;;  %v3479_v63 = vadd.f32 %v3478_v61, %v3477_v59  ;;  %v3480_v1 = vpop.f32.mrb[18].mxu0 }
 0x1af   :  { %v3501_v0 = vadd.f32 %v3500_v62, %v3499_v60  ;;  %v3502_v2 = vpop.f32.mrb[18].mxu1  ;;  %v3481_v3 = vpop.f32.mrb[19].mxu0 }
 0x1b0   :  { %v3503_v4 = vpop.f32.mrb[19].mxu1  ;;  %v2599_v5 = vadd.f32 %v3479_v63, %v2559_v54 }
 0x1b2   :  { %v2639_v6 = vadd.f32 %v3501_v0, %v2599_v5 }
 0x1cc   :  { %v3521_v7 = vpop.f32.mrb[20].mxu0 }
 0x1cd   :  { %v3543_v8 = vpop.f32.mrb[20].mxu1  ;;  %v3522_v9 = vpop.f32.mrb[21].mxu0 }
 0x1ce   :  { %v3523_v10 = vadd.f32 %v3522_v9, %v3521_v7  ;;  %v3544_v11 = vpop.f32.mrb[21].mxu1  ;;  %v3524_v12 = vpop.f32.mrb[22].mxu0 }
 0x1cf   :  { %v3545_v13 = vadd.f32 %v3544_v11, %v3543_v8  ;;  %v3546_v14 = vpop.f32.mrb[22].mxu1  ;;  %v3525_v15 = vpop.f32.mrb[23].mxu0 }
 0x1d0   :  { %v2679_v16 = vadd.f32 %v3523_v10, %v2639_v6  ;;  %v3547_v17 = vpop.f32.mrb[23].mxu1 }
 0x1d2   :  { %v2719_v18 = vadd.f32 %v3545_v13, %v2679_v16 }
 0x1ec   :  { %v3565_v19 = vpop.f32.mrb[24].mxu0 }
 0x1ed   :  { %v3587_v20 = vpop.f32.mrb[24].mxu1  ;;  %v3566_v21 = vpop.f32.mrb[25].mxu0 }
 0x1ee   :  { %v3567_v22 = vadd.f32 %v3566_v21, %v3565_v19  ;;  %v3588_v23 = vpop.f32.mrb[25].mxu1  ;;  %v3568_v24 = vpop.f32.mrb[26].mxu0 }
 0x1ef   :  { %v3589_v25 = vadd.f32 %v3588_v23, %v3587_v20  ;;  %v3590_v26 = vpop.f32.mrb[26].mxu1  ;;  %v3569_v27 = vpop.f32.mrb[27].mxu0 }
 0x1f0   :  { %v2759_v28 = vadd.f32 %v3567_v22, %v2719_v18  ;;  %v3591_v29 = vpop.f32.mrb[27].mxu1 }
 0x1f2   :  { %v2799_v30 = vadd.f32 %v3589_v25, %v2759_v28 }
 0x20c   :  { %v3609_v31 = vpop.f32.mrb[28].mxu0 }
 0x20d   :  { %v3631_v32 = vpop.f32.mrb[28].mxu1  ;;  %v3610_v33 = vpop.f32.mrb[29].mxu0 }
 0x20e   :  { %v3611_v34 = vadd.f32 %v3610_v33, %v3609_v31  ;;  %v3632_v35 = vpop.f32.mrb[29].mxu1  ;;  %v3612_v36 = vpop.f32.mrb[30].mxu0 }
 0x20f   :  { %v3633_v37 = vadd.f32 %v3632_v35, %v3631_v32  ;;  %v3634_v38 = vpop.f32.mrb[30].mxu1  ;;  %v3613_v39 = vpop.f32.mrb[31].mxu0 }
 0x210   :  { %v2839_v40 = vadd.f32 %v3611_v34, %v2799_v30  ;;  %v3635_v41 = vpop.f32.mrb[31].mxu1 }
 0x212   :  { %v2879_v42 = vadd.f32 %v3633_v37, %v2839_v40 }
 0x214   :  { %2977 = vst [vmem:[#allocation8] sm:$0xff] %v2879_v42  ;;  %3687 = vmatmul.mubr.f32.vlgmr.msra.gmra.mrb[32].mxu0 %v2879_v42 }
 0x2e7   :  { %v2973_v44 = vpop.f32.mrb[32].mxu0 }
 0x2e8   :  { %v2974_v45 = vadd.f32 %v3284_v43, %v2973_v44  ;;  %v3688_v46 = vpop.f32.mrb[33].mxu0 }
 0x2ea   :  { %2978 = vst [vmem:[#allocation8 + $0x8] sm:$0xff] %v2974_v45 }
 0x2eb   :  { %4089 = shalt.err (!%p4086_p0)
}
 0x2ec   :  { %s4090_s13 = scalar_lea.hbm %s4206_s5, 256 }
 0x2ed   :  { %p4091_p1 = scmp.ne.s32.totalorder %s4206_s5, %s4090_s13  ;;  %p4094_p2 = scmp.lt.u32.totalorder %s4090_s13, %s4206_s5 }
 0x2ef   :  { %p4096_p3 = pnand %p4094_p2, %p4091_p1 }
 0x2f1   :  { %4099 = shalt.err (!%p4096_p3)
}
 0x2f2   :  { %2988 = dma.vmem_to_hbm [thread:$0]  %s2986_s9, 256, %s4206_s5, [#allocation4]  }
 0x2f3   :  { %4104 = dma.done.wait [#allocation4], 256  }
 0x2f4   :  { %4105 = vsyncadd [#allocation4], 4294967040 }
 0x2f5   :  { %2992 = vsyncpa [#allocation3], 1 }
 0x2f6   :  { %2993 = vsyncpa [#allocation6], 1 }
 0x2f7   :  { %2994 = vsyncpa [#allocation4], 1 }

</bundles_post_ra>
